<compile_context>
chip_gen: v7x
topology: tpu7x:2x2x1
jax: 0.10.0
libtpu: 0.0.40
codegen_flags: <defaults>
</compile_context>

<pallas_src>
import functools

import jax
import jax.numpy as jnp
from jax.experimental import pallas as pl
from jax.experimental.pallas import tpu as pltpu

HIDDEN = 64        # fc1/fc2 width from the PyTorch module
LANES = 128        # TPU lane width; padded feature dimension inside the kernel
NEG_BIG = -1e30    # logit filler for padded action lanes -> exp underflows to exactly 0


def _round_up(x, m):
    return (x + m - 1) // m * m


def _choose_tile(batch):
    """Batch-tile policy (rows per grid step).

    * batch <= 16 : one tile, rounded to 16 rows (bf16 sublane packing).
    * batch  > 16 : >= 2 balanced tiles (both v7x TensorCores active), each tile
      <= 512 rows (amortizes per-step overhead on single-TC v5e/v6e), with
      minimal batch padding.
    """
    if batch <= 16:
        return _round_up(max(batch, 1), 16)
    ntiles = max(2, -(-batch // 512))          # ceil(batch / 512), at least 2
    return _round_up(-(-batch // ntiles), 16)  # balanced tile, multiple of 16


def actor_kernel(s_ref, w_ref, f_ref, o_ref, *, state_dim, sd_pad):
    """One batch tile of the actor MLP.

    s_ref : (TB, state_dim)       f32 state tile
    w_ref : (2*LANES, LANES)      bf16 slab: rows 0:128 = W2 (zero-padded),
                                             rows 128:256 = W3 (zero-padded)
    f_ref : (sd_pad + 8, LANES)   f32 slab: rows 0:state_dim = W1 rows,
                                  row sd_pad = b1, sd_pad+1 = b2, sd_pad+2 = b3
                                  (b3 padded lanes carry -1e30)
    o_ref : (TB, LANES)           bf16 lane-dense softmax output
    """
    x = s_ref[...]                                   # (TB, state_dim) f32

    b1 = f_ref[sd_pad:sd_pad + 1, :]                 # (1, 128)
    b2 = f_ref[sd_pad + 1:sd_pad + 2, :]
    b3 = f_ref[sd_pad + 2:sd_pad + 3, :]

    # fc1 (K = state_dim, tiny): VPU broadcast multiply-adds, no MXU round-trip.
    acc = x[:, 0:1] * f_ref[0:1, :]                  # (TB,1)*(1,128) -> (TB,128)
    for k in range(1, state_dim):                    # static, unrolled at trace time
        acc = acc + x[:, k:k + 1] * f_ref[k:k + 1, :]
    h1 = jnp.maximum(acc + b1, 0.0)                  # lanes 64:128 stay exactly 0

    # fc2: bf16 MXU inputs, f32 accumulation, f32 elementwise.
    h2 = jnp.dot(h1.astype(jnp.bfloat16), w_ref[0:LANES, :],
                 preferred_element_type=jnp.float32) + b2
    h2 = jnp.maximum(h2, 0.0)

    # fc3: bf16 MXU inputs, f32 accumulation. Padded action lanes get -1e30 bias.
    logits = jnp.dot(h2.astype(jnp.bfloat16), w_ref[LANES:2 * LANES, :],
                     preferred_element_type=jnp.float32) + b3

    # Numerically-stable softmax over the padded 128-lane action dim.
    # exp(-1e30 - m) underflows to exactly 0, so padded lanes don't perturb the sum.
    # Exact f32 divide: the kernel is store-bound, the EUP "free slot" buys nothing,
    # and exact normalization keeps row sums == 1 (matters for inverse-CDF sampling).
    m = jnp.max(logits, axis=-1, keepdims=True)
    e = jnp.exp(logits - m)
    denom = jnp.sum(e, axis=-1, keepdims=True)
    probs = e / denom
    o_ref[...] = probs.astype(o_ref.dtype)           # bf16 store: halves HBM writes


def pack_params(params, state_dim, action_dim):
    """Pack the six (in, out)-layout linear params into two VMEM-friendly slabs.

    Returns:
      wslab: (256, 128) bf16  -- [W2 padded to 128x128 ; W3 padded to 128x128]
      fslab: (sd_pad+8, 128) f32 -- W1 rows, then b1 / b2 / b3 rows.
    """
    w1, b1, w2, b2, w3, b3 = params
    sd_pad = _round_up(max(state_dim, 1), 8)

    w2p = jnp.zeros((LANES, LANES), jnp.float32).at[:HIDDEN, :HIDDEN].set(w2)
    w3p = jnp.zeros((LANES, LANES), jnp.float32).at[:HIDDEN, :action_dim].set(w3)
    wslab = jnp.concatenate([w2p, w3p], axis=0).astype(jnp.bfloat16)

    fslab = jnp.zeros((sd_pad + 8, LANES), jnp.float32)
    fslab = fslab.at[:state_dim, :HIDDEN].set(w1)
    fslab = fslab.at[sd_pad, :HIDDEN].set(b1)
    fslab = fslab.at[sd_pad + 1, :HIDDEN].set(b2)
    fslab = fslab.at[sd_pad + 2, :].set(NEG_BIG)
    fslab = fslab.at[sd_pad + 2, :action_dim].set(b3)
    return wslab, fslab


@jax.jit
def actor_forward(state, wslab, fslab):
    """Returns the padded (B_pad, 128) bf16 probability slab.

    Consumers should index rows [:B] and lanes [:action_dim] directly instead of
    materializing a sliced copy (the slice is otherwise a second full HBM pass on a
    store-bound kernel). Padded action lanes are exactly 0; padded batch rows are
    softmax outputs for zero states and must be ignored.
    """
    B, state_dim = state.shape
    sd_pad = fslab.shape[0] - 8

    TB = _choose_tile(B)
    B_pad = _round_up(B, TB)
    if B_pad != B:
        state = jnp.pad(state, ((0, B_pad - B), (0, 0)))

    kernel = functools.partial(actor_kernel, state_dim=state_dim, sd_pad=sd_pad)

    return pl.pallas_call(
        kernel,
        out_shape=jax.ShapeDtypeStruct((B_pad, LANES), jnp.bfloat16),
        grid_spec=pltpu.PrefetchScalarGridSpec(
            num_scalar_prefetch=0,
            grid=(B_pad // TB,),
            in_specs=[
                pl.BlockSpec((TB, state_dim), lambda i: (i, 0)),       # batch tile
                pl.BlockSpec((2 * LANES, LANES), lambda i: (0, 0)),    # weights: VMEM-resident
                pl.BlockSpec((sd_pad + 8, LANES), lambda i: (0, 0)),   # W1+biases: VMEM-resident
            ],
            out_specs=pl.BlockSpec((TB, LANES), lambda i: (i, 0)),     # lane-dense output slab
        ),
        compiler_params=pltpu.CompilerParams(
            dimension_semantics=("parallel",),
        ),
    )(state, wslab, fslab)


def init_linear(key, fan_in, fan_out):
    # PyTorch nn.Linear default init: U(-1/sqrt(fan_in), 1/sqrt(fan_in)).
    # Weights stored (in, out) so the kernel computes x @ W + b (== x @ W_torch.T + b).
    kw, kb = jax.random.split(key)
    bound = 1.0 / jnp.sqrt(jnp.float32(fan_in))
    w = jax.random.uniform(kw, (fan_in, fan_out), jnp.float32, -bound, bound)
    b = jax.random.uniform(kb, (fan_out,), jnp.float32, -bound, bound)
    return w, b


if __name__ == "__main__":
    state_dim = 3     # pendulum observation (cos(theta), sin(theta), theta_dot)
    action_dim = 5    # discrete action bins; Softmax over this dim
    batch = 8

    key = jax.random.PRNGKey(0)
    k_s, k1, k2, k3 = jax.random.split(key, 4)

    state = jax.random.normal(k_s, (batch, state_dim), jnp.float32)
    w1, b1 = init_linear(k1, state_dim, HIDDEN)
    w2, b2 = init_linear(k2, HIDDEN, HIDDEN)
    w3, b3 = init_linear(k3, HIDDEN, action_dim)
    params = (w1, b1, w2, b2, w3, b3)

    # Pack once; reuse the same on-device slabs across calls.
    wslab, fslab = pack_params(params, state_dim, action_dim)

    slab = actor_forward(state, wslab, fslab)
    slab = jax.block_until_ready(slab)

    # Consumer-side view of the lane-dense slab (outside the kernel wrapper).
    out = slab[:batch, :action_dim].astype(jnp.float32)

    # Pure-JAX f32 reference (kernel uses bf16 matmul inputs + bf16 output store,
    # so tolerances are relaxed accordingly).
    def ref_forward(s):
        h = jax.nn.relu(s @ w1 + b1)
        h = jax.nn.relu(h @ w2 + b2)
        return jax.nn.softmax(h @ w3 + b3, axis=-1)

    ref = ref_forward(state)

    assert out.shape == (batch, action_dim)
    # Normalization is exact in f32; only the bf16 output cast perturbs row sums.
    assert bool(jnp.all(jnp.abs(jnp.sum(out, axis=-1) - 1.0) < 5e-3))
    assert bool(jnp.max(jnp.abs(out - ref)) < 5e-2)
    # Padded action lanes carry exactly-zero probability.
    assert bool(jnp.max(jnp.abs(slab[:batch, action_dim:].astype(jnp.float32))) < 1e-6)

    print("KERNEL_OK")
</pallas_src>

<mosaic_0001>
module attributes {stable_mosaic.version = 11 : i64} {
  func.func @actor_kernel(%arg0: i32, %arg1: memref<16x3xf32, #tpu.memory_space<vmem>>, %arg2: memref<256x128xbf16, #tpu.memory_space<vmem>>, %arg3: memref<16x128xf32, #tpu.memory_space<vmem>>, %arg4: memref<16x128xbf16, #tpu.memory_space<vmem>>) attributes {dimension_semantics = [#tpu.dimension_semantics<parallel>], iteration_bounds = array<i64: 1>, scalar_prefetch = 0 : i64, scratch_operands = 0 : i64, tpu.core_type = #tpu.core_type<tc>, window_params = [{transform_indices = @transform_0, window_bounds = array<i64: 16, 3>}, {pipeline_mode = #tpu.pipeline_mode<synchronous>, transform_indices = @transform_1, window_bounds = array<i64: 256, 128>}, {pipeline_mode = #tpu.pipeline_mode<synchronous>, transform_indices = @transform_2, window_bounds = array<i64: 16, 128>}, {transform_indices = @transform_3, window_bounds = array<i64: 16, 128>}]} {
    %c0 = arith.constant 0 : index
    %c0_0 = arith.constant 0 : index
    %0 = vector.load %arg1[%c0, %c0_0] : memref<16x3xf32, #tpu.memory_space<vmem>>, vector<16x3xf32>
    %c8 = arith.constant 8 : index
    %c0_1 = arith.constant 0 : index
    %1 = vector.load %arg3[%c8, %c0_1] : memref<16x128xf32, #tpu.memory_space<vmem>>, vector<1x128xf32>
    %c9 = arith.constant 9 : index
    %c0_2 = arith.constant 0 : index
    %2 = vector.load %arg3[%c9, %c0_2] : memref<16x128xf32, #tpu.memory_space<vmem>>, vector<1x128xf32>
    %c10 = arith.constant 10 : index
    %c0_3 = arith.constant 0 : index
    %3 = vector.load %arg3[%c10, %c0_3] : memref<16x128xf32, #tpu.memory_space<vmem>>, vector<1x128xf32>
    %4 = vector.extract_strided_slice %0 {offsets = [0, 0], sizes = [16, 1], strides = [1, 1]} : vector<16x3xf32> to vector<16x1xf32>
    %c0_4 = arith.constant 0 : index
    %c0_5 = arith.constant 0 : index
    %5 = vector.load %arg3[%c0_4, %c0_5] : memref<16x128xf32, #tpu.memory_space<vmem>>, vector<1x128xf32>
    %6 = vector.broadcast %4 : vector<16x1xf32> to vector<16x128xf32>
    %7 = vector.broadcast %5 : vector<1x128xf32> to vector<16x128xf32>
    %8 = arith.mulf %6, %7 : vector<16x128xf32>
    %9 = vector.extract_strided_slice %0 {offsets = [0, 1], sizes = [16, 1], strides = [1, 1]} : vector<16x3xf32> to vector<16x1xf32>
    %c1 = arith.constant 1 : index
    %c0_6 = arith.constant 0 : index
    %10 = vector.load %arg3[%c1, %c0_6] : memref<16x128xf32, #tpu.memory_space<vmem>>, vector<1x128xf32>
    %11 = vector.broadcast %9 : vector<16x1xf32> to vector<16x128xf32>
    %12 = vector.broadcast %10 : vector<1x128xf32> to vector<16x128xf32>
    %13 = arith.mulf %11, %12 : vector<16x128xf32>
    %14 = arith.addf %8, %13 : vector<16x128xf32>
    %15 = vector.extract_strided_slice %0 {offsets = [0, 2], sizes = [16, 1], strides = [1, 1]} : vector<16x3xf32> to vector<16x1xf32>
    %c2 = arith.constant 2 : index
    %c0_7 = arith.constant 0 : index
    %16 = vector.load %arg3[%c2, %c0_7] : memref<16x128xf32, #tpu.memory_space<vmem>>, vector<1x128xf32>
    %17 = vector.broadcast %15 : vector<16x1xf32> to vector<16x128xf32>
    %18 = vector.broadcast %16 : vector<1x128xf32> to vector<16x128xf32>
    %19 = arith.mulf %17, %18 : vector<16x128xf32>
    %20 = arith.addf %14, %19 : vector<16x128xf32>
    %21 = vector.broadcast %1 : vector<1x128xf32> to vector<16x128xf32>
    %22 = arith.addf %20, %21 : vector<16x128xf32>
    %cst = arith.constant 0.000000e+00 : f32
    %23 = vector.broadcast %cst : f32 to vector<16x128xf32>
    %24 = arith.maximumf %22, %23 : vector<16x128xf32>
    %25 = arith.truncf %24 : vector<16x128xf32> to vector<16x128xbf16>
    %c0_8 = arith.constant 0 : index
    %c0_9 = arith.constant 0 : index
    %26 = vector.load %arg2[%c0_8, %c0_9] : memref<256x128xbf16, #tpu.memory_space<vmem>>, vector<128x128xbf16>
    %cst_10 = arith.constant dense<0.000000e+00> : vector<16x128xf32>
    %27 = tpu.matmul %25, %26, %cst_10 {dimension_numbers = #tpu.dot_dimension_numbers<[1], [0], [0], [1], [0, 0, 1, 1], [], []>} : vector<16x128xbf16>, vector<128x128xbf16>, vector<16x128xf32> -> vector<16x128xf32>
    %28 = vector.broadcast %2 : vector<1x128xf32> to vector<16x128xf32>
    %29 = arith.addf %27, %28 : vector<16x128xf32>
    %cst_11 = arith.constant 0.000000e+00 : f32
    %30 = vector.broadcast %cst_11 : f32 to vector<16x128xf32>
    %31 = arith.maximumf %29, %30 : vector<16x128xf32>
    %32 = arith.truncf %31 : vector<16x128xf32> to vector<16x128xbf16>
    %c128 = arith.constant 128 : index
    %c0_12 = arith.constant 0 : index
    %33 = vector.load %arg2[%c128, %c0_12] : memref<256x128xbf16, #tpu.memory_space<vmem>>, vector<128x128xbf16>
    %cst_13 = arith.constant dense<0.000000e+00> : vector<16x128xf32>
    %34 = tpu.matmul %32, %33, %cst_13 {dimension_numbers = #tpu.dot_dimension_numbers<[1], [0], [0], [1], [0, 0, 1, 1], [], []>} : vector<16x128xbf16>, vector<128x128xbf16>, vector<16x128xf32> -> vector<16x128xf32>
    %35 = vector.broadcast %3 : vector<1x128xf32> to vector<16x128xf32>
    %36 = arith.addf %34, %35 : vector<16x128xf32>
    %cst_14 = arith.constant dense<0xFF800000> : vector<16xf32>
    %37 = vector.multi_reduction <maximumf>, %36, %cst_14 [1] : vector<16x128xf32> to vector<16xf32>
    %38 = vector.shape_cast %37 : vector<16xf32> to vector<16x1xf32>
    %39 = vector.broadcast %38 : vector<16x1xf32> to vector<16x128xf32>
    %40 = arith.subf %36, %39 : vector<16x128xf32>
    %41 = math.exp %40 : vector<16x128xf32>
    %cst_15 = arith.constant dense<0.000000e+00> : vector<16xf32>
    %42 = vector.multi_reduction <add>, %41, %cst_15 [1] : vector<16x128xf32> to vector<16xf32>
    %43 = vector.shape_cast %42 : vector<16xf32> to vector<16x1xf32>
    %44 = vector.broadcast %43 : vector<16x1xf32> to vector<16x128xf32>
    %45 = arith.divf %41, %44 : vector<16x128xf32>
    %46 = arith.truncf %45 : vector<16x128xf32> to vector<16x128xbf16>
    %c0_16 = arith.constant 0 : index
    %c0_17 = arith.constant 0 : index
    %47 = vector.load %arg4[%c0_16, %c0_17] : memref<16x128xbf16, #tpu.memory_space<vmem>>, vector<16x128xbf16>
    tpu.vector_store %arg4[%c0_16, %c0_17], %46 {strides = array<i32>} : memref<16x128xbf16, #tpu.memory_space<vmem>>, vector<16x128xbf16>,
    return
  }
  func.func @transform_0(%arg0: i32) -> (i32, i32) {
    %c0_i32 = arith.constant 0 : i32
    %c0_i32_0 = arith.constant 0 : i32
    return %arg0, %c0_i32 : i32, i32
  }
  func.func @transform_1(%arg0: i32) -> (i32, i32) {
    %c0_i32 = arith.constant 0 : i32
    %c0_i32_0 = arith.constant 0 : i32
    %c0_i32_1 = arith.constant 0 : i32
    return %c0_i32, %c0_i32_0 : i32, i32
  }
  func.func @transform_2(%arg0: i32) -> (i32, i32) {
    %c0_i32 = arith.constant 0 : i32
    %c0_i32_0 = arith.constant 0 : i32
    %c0_i32_1 = arith.constant 0 : i32
    return %c0_i32, %c0_i32_0 : i32, i32
  }
  func.func @transform_3(%arg0: i32) -> (i32, i32) {
    %c0_i32 = arith.constant 0 : i32
    %c0_i32_0 = arith.constant 0 : i32
    return %arg0, %c0_i32 : i32, i32
  }
}

</mosaic_0001>

<bundles_post_ra>
// kernel: actor_forward.1
= control target key start
LH: loop header
LB: loop body
LE: loop exit
PB: predicated region body
PF: predicated region fallthrough
CT: control target
= control target key end

     0   :  { %8 = vsyncpa [#allocation3], 0  ;;  %s636_s0 = inlined_call_operand.vmem [shape: f32[16,3], index: 0, kind: input, shape index: {}]   ;;  %s637_s1 = inlined_call_operand.hbm [shape: bf16[256,128], index: 1, kind: input, shape index: {}]   ;;  %s638_s2 = inlined_call_operand.vmem [shape: f32[16,128], index: 2, kind: input, shape index: {}]   ;;  %s639_s3 = inlined_call_operand.hbm [shape: bf16[16,128], index: 3, kind: output, shape index: {}]  }
   0x1   :  { %9 = vsyncpa [#allocation4], 0  ;;  %s535_s12 = smov [#allocation2]   ;;  %s487_s16 = scalar_lea.hbm %s637_s1, 2048 }
   0x2   :  { %s17_s13 = sshll.u32 %s535_s12, 4  ;;  %p488_p0 = scmp.ne.s32.totalorder %s637_s1, %s487_s16  ;;  %s18_s13 = int_to_ptr.vmem [resolvable:$true] %s17_s13 }
   0x3   :  { %p491_p1 = scmp.lt.u32.totalorder %s487_s16, %s637_s1 }
   0x5   :  { %p493_p2 = pnand %p491_p1, %p488_p0 }
   0x7   :  { %496 = shalt.err (!%p493_p2)
}
   0x8   :  { %s497_s21 = scalar_lea.vmem %s18_s13, 2048  ;;  %p502_p4 = scmp.lt.s32.totalorder %s18_s13, %s18_s13 }
   0x9   :  { %p498_p3 = scmp.ne.s32.totalorder %s18_s13, %s497_s21  ;;  %p503_p5 = scmp.lt.s32.totalorder %s497_s21, %s497_s21 }
   0xb   :  { %p504_p6 = por %p503_p5, %p502_p4 }
   0xd   :  { %p505_p7 = pnand %p504_p6, %p498_p3 }
   0xf   :  { %508 = shalt.err (!%p505_p7)
}
  0x10   :  { %s536_s22 = smov 64   ;;  %s537_s23 = smov 4  }
  0x11   :  { %23 = dma.hbm_to_vmem [thread:$0]  %s637_s1, 2048, %s18_s13, [#allocation3], %s536_s22, %s536_s22, %s537_s23  }
  0x12   :  { %531 = dma.done.wait [#allocation3], 2048  }
  0x13   :  { %532 = vsyncadd [#allocation3], 4294965248  ;;  %v538_v0 = vmov 1   ;;  %v539_v1 = vmov 0   ;;  %v540_v2 = vmov 0.0   ;;  %v30_v3 = vld [vmem:[%s636_s0] sm:$0xff] }
  0x14   :  { %460 = vset.pattern.permute.xlu1 %v538_v0  ;;  %459 = vset.pattern.permute.xlu0 %v539_v1  ;;  %v463_v4 = vld [vmem:[#allocation2] sm:$0xff]   ;;  %v31_v5 = vld [vmem:[%s636_s0 + $0x8] sm:$0xff]  ;;  %v464_v6 = vld [vmem:[#allocation2 + $0x8] sm:$0xff]   ;;  %v541_v8 = vmov 2   ;;  %vm542_vm0 = vmmov 0  }
  0x15   :  { %410 = vmatprep.subr.bf16.mxu0 %v540_v2  ;;  %430 = vmatprep.subr.bf16.mxu1 %v540_v2  ;;  %v465_v7 = vld [vmem:[#allocation2 + $0x10] sm:$0xff]   ;;  %v466_v9 = vld [vmem:[#allocation2 + $0x18] sm:$0xff]   ;;  %v467_v10 = vld [vmem:[#allocation2 + $0x20] sm:$0xff]  }
  0x16   :  { %54 = vperm.xlu1 %460, %v30_v3   ;;  %38 = vperm.xlu0 %459, %v30_v3   ;;  %v468_v11 = vld [vmem:[#allocation2 + $0x28] sm:$0xff]   ;;  %v471_v12 = vld [vmem:[#allocation2 + $0x40] sm:$0xff]   ;;  %v469_v14 = vld [vmem:[#allocation2 + $0x30] sm:$0xff]  }
  0x17   :  { %411 = vmatpush3.bf16.msra.mxu0 %v463_v4  ;;  %426 = vmatprep.mubr.msk.bf16.mxu0 %vm542_vm0, %v540_v2  ;;  %v472_v13 = vld [vmem:[#allocation2 + $0x48] sm:$0xff]   ;;  %v473_v15 = vld [vmem:[#allocation2 + $0x50] sm:$0xff]   ;;  %v470_v16 = vld [vmem:[#allocation2 + $0x38] sm:$0xff]  }
  0x18   :  { %412 = vmatprep.subr.bf16.mxu0 %v540_v2  ;;  %446 = vmatprep.mubr.msk.bf16.mxu1 %vm542_vm0, %v540_v2  ;;  %v474_v17 = vld [vmem:[#allocation2 + $0x58] sm:$0xff]   ;;  %v475_v18 = vld [vmem:[#allocation2 + $0x60] sm:$0xff]   ;;  %v476_v19 = vld [vmem:[#allocation2 + $0x68] sm:$0xff]  }
  0x19   :  { %431 = vmatpush3.bf16.msra.mxu1 %v471_v12  ;;  %v362_v22 = vld [vmem:[%s638_s2 + $0x1] ss:$0 sm:$0xff]  ;;  %v361_v23 = vld [vmem:[%s638_s2] ss:$0 sm:$0xff]  ;;  %v363_v30 = vld [vmem:[%s638_s2 + $0x2] ss:$0 sm:$0xff] }
  0x1a   :  { %58 = vperm.xlu1 %460, %v31_v5   ;;  %43 = vperm.xlu0 %459, %v31_v5   ;;  %v364_v37 = vld [vmem:[%s638_s2 + $0x8] ss:$0 sm:$0xff]  ;;  %v477_v45 = vld [vmem:[#allocation2 + $0x70] sm:$0xff]   ;;  %v365_v47 = vld [vmem:[%s638_s2 + $0x9] ss:$0 sm:$0xff] }
  0x1b   :  { %413 = vmatpush3.bf16.msra.mxu0 %v464_v6  ;;  %432 = vmatprep.subr.bf16.mxu1 %v540_v2  ;;  %v478_v46 = vld [vmem:[#allocation2 + $0x78] sm:$0xff]  }
  0x1c   :  { %414 = vmatprep.subr.bf16.mxu0 %v540_v2  ;;  %v374_v57 = vld [vmem:[%s638_s2 + $0xa] ss:$0 sm:$0xff]  ;;  %s543_s2 = smov [#allocation5]  }
  0x1d   :  { %433 = vmatpush3.bf16.msra.mxu1 %v472_v13  ;;  %s349_s13 = sshll.u32 %s543_s2, 4  ;;  %s350_s13 = int_to_ptr.vmem [resolvable:$true] %s349_s13 }
  0x1e   :  { %462 = vset.pattern.permute.xlu1 %v541_v8  ;;  %461 = vset.pattern.permute.xlu0 %v541_v8  ;;  %s509_s14 = scalar_lea.vmem %s350_s13, 128  ;;  %p514_p9 = scmp.lt.s32.totalorder %s350_s13, %s350_s13 }
  0x1f   :  { %75 = vperm.xlu1 %462, %v31_v5   ;;  %71 = vperm.xlu0 %461, %v30_v3   ;;  %p510_p8 = scmp.ne.s32.totalorder %s350_s13, %s509_s14  ;;  %p515_p10 = scmp.lt.s32.totalorder %s509_s14, %s509_s14 }
  0x20   :  { %415 = vmatpush3.bf16.msra.mxu0 %v465_v7  ;;  %434 = vmatprep.subr.bf16.mxu1 %v540_v2 }
  0x21   :  { %416 = vmatprep.subr.bf16.mxu0 %v540_v2  ;;  %435 = vmatpush3.bf16.msra.mxu1 %v473_v15  ;;  %p516_p11 = por %p515_p10, %p514_p9 }
  0x22   :  { %436 = vmatprep.subr.bf16.mxu1 %v540_v2 }
  0x23   :  { %p517_p12 = pnand %p516_p11, %p510_p8 }
  0x24   :  { %417 = vmatpush3.bf16.msra.mxu0 %v466_v9 }
  0x25   :  { %418 = vmatprep.subr.bf16.mxu0 %v540_v2  ;;  %437 = vmatpush3.bf16.msra.mxu1 %v474_v17 }
  0x26   :  { %438 = vmatprep.subr.bf16.mxu1 %v540_v2 }
  0x28   :  { %419 = vmatpush3.bf16.msra.mxu0 %v467_v10 }
  0x29   :  { %420 = vmatprep.subr.bf16.mxu0 %v540_v2  ;;  %439 = vmatpush3.bf16.msra.mxu1 %v475_v18 }
  0x2a   :  { %440 = vmatprep.subr.bf16.mxu1 %v540_v2 }
  0x2c   :  { %421 = vmatpush3.bf16.msra.mxu0 %v468_v11 }
  0x2d   :  { %422 = vmatprep.subr.bf16.mxu0 %v540_v2  ;;  %441 = vmatpush3.bf16.msra.mxu1 %v476_v19 }
  0x2e   :  { %442 = vmatprep.subr.bf16.mxu1 %v540_v2 }
  0x30   :  { %423 = vmatpush3.bf16.msra.mxu0 %v469_v14 }
  0x31   :  { %424 = vmatprep.subr.bf16.mxu0 %v540_v2  ;;  %443 = vmatpush3.bf16.msra.mxu1 %v477_v45 }
  0x32   :  { %444 = vmatprep.subr.bf16.mxu1 %v540_v2 }
  0x34   :  { %425 = vmatpush3.bf16.msra.mxu0 %v470_v16 }
  0x35   :  { %445 = vmatpush3.bf16.msra.mxu1 %v478_v46 }
  0x95   :  { %v55_v20 = vpop.permute.xlu1 %54  ;;  %v39_v21 = vpop.permute.xlu0 %38 }
  0x96   :  { %v65_v26 = vmul.f32 %v362_v22, %v55_v20  ;;  %v50_v27 = vmul.f32 %v361_v23, %v39_v21 }
  0x98   :  { %v67_v33 = vadd.f32 %v65_v26, %v50_v27 }
  0x99   :  { %v59_v24 = vpop.permute.xlu1 %58  ;;  %v44_v25 = vpop.permute.xlu0 %43 }
  0x9a   :  { %v66_v28 = vmul.f32 %v362_v22, %v59_v24  ;;  %v51_v29 = vmul.f32 %v361_v23, %v44_v25 }
  0x9c   :  { %v68_v34 = vadd.f32 %v66_v28, %v51_v29 }
  0x9e   :  { %v76_v31 = vpop.permute.xlu1 %75  ;;  %v72_v32 = vpop.permute.xlu0 %71 }
  0x9f   :  { %v83_v35 = vmul.f32 %v363_v30, %v76_v31  ;;  %v82_v36 = vmul.f32 %v363_v30, %v72_v32 }
  0xa1   :  { %v85_v38 = vadd.f32 %v83_v35, %v68_v34  ;;  %v84_v39 = vadd.f32 %v82_v36, %v67_v33 }
  0xa3   :  { %v91_v40 = vadd.f32 %v364_v37, %v85_v38  ;;  %v90_v41 = vadd.f32 %v364_v37, %v84_v39 }
  0xa5   :  { %v93_v42 = vmax.f32 %v91_v40, 0.0  ;;  %v92_v43 = vmax.f32 %v90_v41, 0.0 }
  0xa7   :  { %v94_v44 = vpack.c.bf16 %v93_v42, %v92_v43 }
  0xa9   :  { %427 = vmatmul.mubr.bf16.vlgmr.msra.gmra.mrb[0].mxu0 %v94_v44 }
 0x17c   :  { %v197_v48 = vpop.f32.mrb[0].mxu0 }
 0x17d   :  { %v198_v49 = vadd.f32 %v365_v47, %v197_v48  ;;  %v428_v50 = vpop.f32.mrb[1].mxu0 }
 0x17e   :  { %v200_v51 = vpop.f32.mrb[2].mxu0 }
 0x17f   :  { %v201_v52 = vadd.f32 %v365_v47, %v200_v51  ;;  %v429_v53 = vpop.f32.mrb[3].mxu0  ;;  %v204_v54 = vmax.f32 %v198_v49, 0.0 }
 0x181   :  { %v205_v55 = vmax.f32 %v201_v52, 0.0 }
 0x183   :  { %v206_v56 = vpack.c.bf16 %v205_v55, %v204_v54 }
 0x185   :  { %447 = vmatmul.mubr.bf16.vlgmr.msra.gmra.mrb[0].mxu1 %v206_v56 }
 0x258   :  { %v309_v58 = vpop.f32.mrb[0].mxu1 }
 0x259   :  { %v310_v59 = vadd.f32 %v374_v57, %v309_v58  ;;  %v448_v60 = vpop.f32.mrb[1].mxu1 }
 0x25a   :  { %v312_v61 = vpop.f32.mrb[2].mxu1 }
 0x25b   :  { %v313_v62 = vadd.f32 %v374_v57, %v312_v61  ;;  %316 = vmax.xlane.f32.xlu1 %v310_v59  ;;  %v449_v63 = vpop.f32.mrb[3].mxu1 }
 0x25d   :  { %318 = vmax.xlane.f32.xlu0 %v313_v62 }
 0x2e8   :  { %v317_v0 = vpop.xlane.xlu1 %316 }
 0x2e9   :  { %v320_v1 = vsub.f32 %v310_v59, %v317_v0 }
 0x2ea   :  { %v319_v2 = vpop.xlane.xlu0 %318 }
 0x2eb   :  { %v322_v3 = vmul.f32 1.442695, %v320_v1  ;;  %v321_v4 = vsub.f32 %v313_v62, %v319_v2 }
 0x2ed   :  { %479 = vpow2.f32 %v322_v3  ;;  %v324_v5 = vmul.f32 1.442695, %v321_v4 }
 0x2ef   :  { %481 = vpow2.f32 %v324_v5 }
 0x2f7   :  { %v480_v6 = vpop.eup %479 }
 0x2f8   :  { %326 = vadd.xlane.f32.xlu0 %v480_v6 }
 0x2f9   :  { %v482_v7 = vpop.eup %481 }
 0x2fa   :  { %328 = vadd.xlane.f32.xlu1 %v482_v7 }
 0x385   :  { %v327_v8 = vpop.xlane.xlu0 %326 }
 0x386   :  { %483 = vrcp.f32 %v327_v8 }
 0x387   :  { %v329_v9 = vpop.xlane.xlu1 %328 }
 0x388   :  { %485 = vrcp.f32 %v329_v9 }
 0x390   :  { %v484_v10 = vpop.eup %483 }
 0x391   :  { %v331_v12 = vmul.f32 %v484_v10, %v480_v6 }
 0x392   :  { %v486_v11 = vpop.eup %485 }
 0x393   :  { %v333_v13 = vmul.f32 %v486_v11, %v482_v7 }
 0x395   :  { %v390_v14 = vpack.c.bf16 %v333_v13, %v331_v12 }
 0x397   :  { %391 = vst [vmem:[#allocation5] sm:$0xff] %v390_v14  }
 0x398   :  { %520 = shalt.err (!%p517_p12)
}
 0x399   :  { %s521_s17 = scalar_lea.hbm %s639_s3, 128 }
 0x39a   :  { %p522_p13 = scmp.ne.s32.totalorder %s639_s3, %s521_s17  ;;  %p525_p0 = scmp.lt.u32.totalorder %s521_s17, %s639_s3 }
 0x39c   :  { %p527_p1 = pnand %p525_p0, %p522_p13 }
 0x39e   :  { %530 = shalt.err (!%p527_p1)
}
 0x39f   :  { %355 = dma.vmem_to_hbm [thread:$0]  %s350_s13, 128, %s639_s3, [#allocation4], %s536_s22, %s536_s22, %s537_s23  }
 0x3a0   :  { %533 = dma.done.wait [#allocation4], 128  }
 0x3a1   :  { %534 = vsyncadd [#allocation4], 4294967168 }
 0x3a2   :  { %359 = vsyncpa [#allocation3], 1 }
 0x3a3   :  { %360 = vsyncpa [#allocation4], 1 }

</bundles_post_ra>
